<compile_context>
chip_gen: v6e
topology: v6e:2x2x1
jax: 0.10.0
libtpu: 0.0.40
codegen_flags: <defaults>
</compile_context>

<pallas_src>
import jax
import jax.numpy as jnp
from jax import lax
from jax.experimental import pallas as pl
from jax.experimental.pallas import tpu as pltpu

BETA = 8.0           # Hopfield inverse temperature (hard-coded in reference)
TAU = 1.0 / 30.0     # CLOOB tau (set in CLOOB_Loss.__init__)
INV_TAU = 1.0 / TAU
_NEG = -1e30         # "minus infinity" for masked max / logsumexp (f32-safe)
_TB_MAX = 128        # loss instances per grid step (lane-dense output row)
_LANE = 128


def _round_up(v, m):
    return (v + m - 1) // m * m


# ------------------------------ kernel --------------------------------------

def cloob_loss_kernel(x_ref, y_ref, o_ref):
    # x_ref / y_ref: [TB, N, D] blocks of embeddings; o_ref: [1, 1, TB] losses.
    x = x_ref[...].astype(jnp.float32)
    y = y_ref[...].astype(jnp.float32)
    tb, n, d = x.shape
    n2 = 2 * n

    # ---- one fused Gram matmul: z = [x; y] -> G = z z^T ----------------------
    z = jnp.concatenate([x, y], axis=-2)                        # [TB, 2N, D]
    g = jnp.einsum('bnd,bmd->bnm', z, z,
                   preferred_element_type=jnp.float32)          # [TB, 2N, 2N]

    # Iota masks built once and shared.
    row = lax.broadcasted_iota(jnp.int32, (1, n2, n2), 1)
    col = lax.broadcasted_iota(jnp.int32, (1, n2, n2), 2)
    left = col < n                            # column half selector
    same_half = (row < n) == left             # row/col in the same N-block
    is_diag = row == col
    loo_valid = same_half & (row != col)      # off-diagonal, same-block entries

    # ---- block-local row softmax over the two column halves of G -------------
    #   att[:, :N, :N] = softmax(beta * x x^T)    (Hopfield(x, x) attention)
    #   att[:, :N, N:] = softmax(beta * x y^T)    (Hopfield(y, x))
    #   att[:, N:, :N] = softmax(beta * y x^T)    (Hopfield(x, y))
    #   att[:, N:, N:] = softmax(beta * y y^T)    (Hopfield(y, y))
    s = BETA * g
    m_l = jnp.max(jnp.where(left, s, _NEG), axis=-1, keepdims=True)
    m_r = jnp.max(jnp.where(left, _NEG, s), axis=-1, keepdims=True)
    e = jnp.exp(s - jnp.where(left, m_l, m_r))
    d_l = jnp.sum(jnp.where(left, e, 0.0), axis=-1, keepdims=True)
    d_r = jnp.sum(jnp.where(left, 0.0, e), axis=-1, keepdims=True)
    # Exact division kept on purpose: approx reciprocal error is amplified by
    # exp(30 * cos) downstream and can exceed the 1e-3 validation tolerance.
    att = e / jnp.where(left, d_l, d_r)                         # [TB, 2N, 2N]

    # ---- two fused Hopfield retrieval contractions ---------------------------
    # out[i] = sum_j att[j, i] * memory[j]; memory = x for the top rows of G,
    # y for the bottom rows, so the 4 retrievals collapse into 2 matmuls.
    r_u = jnp.einsum('bji,bjd->bid', att[:, :n, :], x,
                     preferred_element_type=jnp.float32)        # [TB,2N,D]=[Ux;Uy]
    r_v = jnp.einsum('bji,bjd->bid', att[:, n:, :], y,
                     preferred_element_type=jnp.float32)        # [TB,2N,D]=[Vx;Vy]

    def l2norm(t):
        # F.normalize(t, dim=1) with eps=1e-12, via rsqrt (EUP) + squared clamp.
        ss = jnp.sum(t * t, axis=-1, keepdims=True)
        return t * lax.rsqrt(jnp.maximum(ss, 1e-24))

    r_u = l2norm(r_u)
    r_v = l2norm(r_v)

    # ---- fused leave-one-out InfoLOOB (one matmul + masked logsumexp) --------
    p = jnp.concatenate([r_u[:, :n, :], r_v[:, :n, :]], axis=-2)   # [Ux; Vx]
    q = jnp.concatenate([r_u[:, n:, :], r_v[:, n:, :]], axis=-2)   # [Uy; Vy]
    sc = jnp.einsum('bnd,bmd->bnm', p, q,
                    preferred_element_type=jnp.float32) * INV_TAU  # [TB,2N,2N]
    # Block [:N,:N] = Ux Uy^T / tau,  block [N:,N:] = Vx Vy^T / tau.
    # log A_i = sc[i,i] - logsumexp_{j != i, same block}(sc[j,i]); computed with
    # a masked logsumexp -> no catastrophic cancellation, no -inf/NaN path.
    num = jnp.sum(jnp.where(is_diag, sc, 0.0), axis=-2, keepdims=True)  # [TB,1,2N]
    off = jnp.where(loo_valid, sc, _NEG)
    m = jnp.max(off, axis=-2, keepdims=True)
    den = jnp.sum(jnp.exp(off - m), axis=-2, keepdims=True)
    log_ratio = num - m - jnp.log(den)                                  # [TB,1,2N]

    # -mean_i(log A_i + log B_i) = -(sum over all 2N columns) / N.
    # torch.clamp(min=1e-300) underflows to 0.0 in f32 and A, B > 0: dropped.
    loss = jnp.sum(log_ratio, axis=-1) * (-1.0 / n)                     # [TB, 1]
    o_ref[...] = loss.reshape(1, 1, tb)     # lane-dense per-step output row


# ------------------------------ wrappers -------------------------------------

def _cloob_pallas(xb, yb, tb_max=_TB_MAX):
    b, n, d = xb.shape

    steps = pl.cdiv(b, tb_max)
    if steps > 1 and steps % 2:
        steps += 1                         # keep grid even for v7x megacore
    tb = pl.cdiv(b, steps)
    b_pad = steps * tb
    if b_pad != b:
        pad = b_pad - b                    # pad with copies of the last instance
        xb = jnp.concatenate([xb, jnp.broadcast_to(xb[-1:], (pad, n, d))], axis=0)
        yb = jnp.concatenate([yb, jnp.broadcast_to(yb[-1:], (pad, n, d))], axis=0)

    # Per-step VMEM footprint with (8,128) lane padding: double-buffered input
    # blocks + ~12 live f32 [2N, *] temporaries per instance; 2x safety factor,
    # clamped <= 48 MiB so it stays inside v7x's 64 MiB physical VMEM.
    per_inst = (2 * 2 * n * _round_up(d, _LANE) * 4
                + 12 * (2 * n) * _round_up(2 * n, _LANE) * 4)
    vmem_limit = int(min(48 * 1024 * 1024,
                         max(16 * 1024 * 1024, 2 * per_inst * tb)))

    out = pl.pallas_call(
        cloob_loss_kernel,
        out_shape=jax.ShapeDtypeStruct((steps, 1, tb), jnp.float32),
        grid_spec=pltpu.PrefetchScalarGridSpec(
            num_scalar_prefetch=0,
            grid=(steps,),
            in_specs=[pl.BlockSpec((tb, n, d), lambda i: (i, 0, 0)),
                      pl.BlockSpec((tb, n, d), lambda i: (i, 0, 0))],
            out_specs=pl.BlockSpec((1, 1, tb), lambda i: (i, 0, 0)),
        ),
        compiler_params=pltpu.CompilerParams(
            # Independent loss instances per grid step -> megacore-shardable.
            dimension_semantics=("parallel",),
            vmem_limit_bytes=vmem_limit,
        ),
    )(xb, yb)
    return out.reshape(-1)[:b]


@jax.jit
def cloob_loss_batched(x, y):
    """CLOOB loss for a stack of independent (x, y) pairs: [B, N, D] -> [B]."""
    return _cloob_pallas(x, y)


@jax.jit
def cloob_loss(x, y):
    """CLOOB_Loss.forward(molecule_embedding, properties_embedding) -> scalar."""
    # TODO(synk): the Gaussian (logvar) path via inner_gaussian is not
    # implemented; it is unreachable in the reference forward for tensor
    # logvars (`tensor != None` truth-value raises), so only the default
    # None path (plain dot-product similarity) is reproduced.
    return _cloob_pallas(x[None], y[None])[0]


# -------------------------- pure-JAX reference -------------------------------

def _reference(x, y):
    def hopfield(a, b, beta=BETA):
        att = jax.nn.softmax(beta * (b @ a.T), axis=-1)
        out = (b.T @ att).T
        nrm = jnp.linalg.norm(out, axis=1, keepdims=True)
        return out / jnp.maximum(nrm, 1e-12)

    def loo(xe, ye, tau=TAU):
        mat = jnp.exp((xe @ ye.T) / tau)
        num = jnp.diagonal(mat)
        mask = jnp.ones((xe.shape[0], xe.shape[0])) - jnp.eye(xe.shape[0])
        denom = jnp.diagonal(mask @ mat)
        return num / denom

    ux = hopfield(x, x)
    uy = hopfield(y, x)
    vx = hopfield(x, y)
    vy = hopfield(y, y)
    a = jnp.maximum(loo(ux, uy), jnp.float32(1e-300))
    b = jnp.maximum(loo(vx, vy), jnp.float32(1e-300))
    return -jnp.mean(jnp.log(a) + jnp.log(b))


# --------------------------------- main --------------------------------------

if __name__ == "__main__":
    key = jax.random.PRNGKey(0)
    kx, ky = jax.random.split(key)
    N, D = 8, 32  # batch of 8 molecule/property embeddings, hidden = 32
    x = jax.random.normal(kx, (N, D), dtype=jnp.float32)
    y = jax.random.normal(ky, (N, D), dtype=jnp.float32)

    loss = jax.block_until_ready(cloob_loss(x, y))
    ref = jax.block_until_ready(_reference(x, y))
    assert jnp.isfinite(loss), ("non-finite loss", loss)
    assert jnp.allclose(loss, ref, rtol=1e-3, atol=1e-3), (loss, ref)

    # Batched path: all B instances packed into one grid step.
    B = 2
    kb = jax.random.split(jax.random.PRNGKey(1), 2 * B)
    xb = jnp.stack([jax.random.normal(kb[2 * i], (N, D), dtype=jnp.float32)
                    for i in range(B)])
    yb = jnp.stack([jax.random.normal(kb[2 * i + 1], (N, D), dtype=jnp.float32)
                    for i in range(B)])
    losses = jax.block_until_ready(cloob_loss_batched(xb, yb))
    refs = jnp.stack([_reference(xb[i], yb[i]) for i in range(B)])
    assert jnp.all(jnp.isfinite(losses)), losses
    assert jnp.allclose(losses, refs, rtol=1e-3, atol=1e-3), (losses, refs)

    # Multi-step grid: exercises batch padding, the even-grid heuristic and the
    # per-step lane-dense output path (small tb_max just for coverage).
    B2 = 5
    kb2 = jax.random.split(jax.random.PRNGKey(2), 2 * B2)
    xb2 = jnp.stack([jax.random.normal(kb2[2 * i], (N, D), dtype=jnp.float32)
                     for i in range(B2)])
    yb2 = jnp.stack([jax.random.normal(kb2[2 * i + 1], (N, D), dtype=jnp.float32)
                     for i in range(B2)])
    losses2 = jax.block_until_ready(_cloob_pallas(xb2, yb2, tb_max=2))
    refs2 = jnp.stack([_reference(xb2[i], yb2[i]) for i in range(B2)])
    assert jnp.allclose(losses2, refs2, rtol=1e-3, atol=1e-3), (losses2, refs2)

    print("KERNEL_OK")
</pallas_src>

<mosaic_0001>
module attributes {stable_mosaic.version = 11 : i64} {
  func.func @cloob_loss_kernel(%arg0: i32, %arg1: memref<1x8x32xf32, #tpu.memory_space<vmem>>, %arg2: memref<1x8x32xf32, #tpu.memory_space<vmem>>, %arg3: memref<1x1x1xf32, #tpu.memory_space<vmem>>) attributes {dimension_semantics = [#tpu.dimension_semantics<parallel>], iteration_bounds = array<i64: 1>, scalar_prefetch = 0 : i64, scratch_operands = 0 : i64, tpu.core_type = #tpu.core_type<tc>, window_params = [{transform_indices = @transform_0, window_bounds = array<i64: 1, 8, 32>}, {transform_indices = @transform_1, window_bounds = array<i64: 1, 8, 32>}, {transform_indices = @transform_2, window_bounds = array<i64: 1, 1, 1>}]} {
    %c0 = arith.constant 0 : index
    %c0_0 = arith.constant 0 : index
    %c0_1 = arith.constant 0 : index
    %0 = vector.load %arg1[%c0, %c0_0, %c0_1] : memref<1x8x32xf32, #tpu.memory_space<vmem>>, vector<1x8x32xf32>
    %c0_2 = arith.constant 0 : index
    %c0_3 = arith.constant 0 : index
    %c0_4 = arith.constant 0 : index
    %1 = vector.load %arg2[%c0_2, %c0_3, %c0_4] : memref<1x8x32xf32, #tpu.memory_space<vmem>>, vector<1x8x32xf32>
    %2 = tpu.concatenate %0, %1 in 1 : vector<1x8x32xf32>, vector<1x8x32xf32> -> vector<1x16x32xf32>
    "tpu.trace_start"() <{level = 10 : i32, message = "bnd,bmd->bnm"}> : () -> ()
    %cst = arith.constant dense<0.000000e+00> : vector<1x16x16xf32>
    %3 = tpu.matmul %2, %2, %cst {dimension_numbers = #tpu.dot_dimension_numbers<[2], [2], [1], [1], [0, 0, 0, 1, 1, 1], [0], [0]>} : vector<1x16x32xf32>, vector<1x16x32xf32>, vector<1x16x16xf32> -> vector<1x16x16xf32>
    "tpu.trace_stop"() : () -> ()
    %4 = tpu.iota {dimensions = array<i32: 1>} : vector<1x16x16xi32>
    %5 = tpu.iota {dimensions = array<i32: 2>} : vector<1x16x16xi32>
    %c8_i32 = arith.constant 8 : i32
    %6 = vector.broadcast %c8_i32 : i32 to vector<1x16x16xi32>
    %7 = arith.cmpi slt, %5, %6 : vector<1x16x16xi32>
    %c8_i32_5 = arith.constant 8 : i32
    %8 = vector.broadcast %c8_i32_5 : i32 to vector<1x16x16xi32>
    %9 = arith.cmpi slt, %4, %8 : vector<1x16x16xi32>
    %10 = arith.xori %9, %7 : vector<1x16x16xi1>
    %cst_6 = arith.constant dense<true> : vector<1x16x16xi1>
    %11 = arith.xori %10, %cst_6 : vector<1x16x16xi1>
    %12 = arith.cmpi eq, %4, %5 : vector<1x16x16xi32>
    %13 = arith.cmpi ne, %4, %5 : vector<1x16x16xi32>
    %14 = arith.andi %11, %13 : vector<1x16x16xi1>
    %cst_7 = arith.constant 8.000000e+00 : f32
    %15 = vector.broadcast %cst_7 : f32 to vector<1x16x16xf32>
    %16 = arith.mulf %15, %3 : vector<1x16x16xf32>
    %cst_8 = arith.constant -1.000000e+30 : f32
    %17 = vector.broadcast %cst_8 : f32 to vector<1x16x16xf32>
    %18 = arith.select %7, %16, %17 : vector<1x16x16xi1>, vector<1x16x16xf32>
    %cst_9 = arith.constant dense<0xFF800000> : vector<1x16xf32>
    %19 = vector.multi_reduction <maximumf>, %18, %cst_9 [2] : vector<1x16x16xf32> to vector<1x16xf32>
    %20 = vector.shape_cast %19 : vector<1x16xf32> to vector<1x16x1xf32>
    %cst_10 = arith.constant -1.000000e+30 : f32
    %21 = vector.broadcast %cst_10 : f32 to vector<1x16x16xf32>
    %22 = arith.select %7, %21, %16 : vector<1x16x16xi1>, vector<1x16x16xf32>
    %cst_11 = arith.constant dense<0xFF800000> : vector<1x16xf32>
    %23 = vector.multi_reduction <maximumf>, %22, %cst_11 [2] : vector<1x16x16xf32> to vector<1x16xf32>
    %24 = vector.shape_cast %23 : vector<1x16xf32> to vector<1x16x1xf32>
    %25 = vector.shape_cast %20 : vector<1x16x1xf32> to vector<1x16x1xf32>
    %26 = vector.broadcast %25 : vector<1x16x1xf32> to vector<1x16x16xf32>
    %27 = vector.shape_cast %24 : vector<1x16x1xf32> to vector<1x16x1xf32>
    %28 = vector.broadcast %27 : vector<1x16x1xf32> to vector<1x16x16xf32>
    %29 = arith.select %7, %26, %28 : vector<1x16x16xi1>, vector<1x16x16xf32>
    %30 = arith.subf %16, %29 : vector<1x16x16xf32>
    %31 = math.exp %30 : vector<1x16x16xf32>
    %cst_12 = arith.constant 0.000000e+00 : f32
    %32 = vector.broadcast %cst_12 : f32 to vector<1x16x16xf32>
    %33 = arith.select %7, %31, %32 : vector<1x16x16xi1>, vector<1x16x16xf32>
    %cst_13 = arith.constant dense<0.000000e+00> : vector<1x16xf32>
    %34 = vector.multi_reduction <add>, %33, %cst_13 [2] : vector<1x16x16xf32> to vector<1x16xf32>
    %35 = vector.shape_cast %34 : vector<1x16xf32> to vector<1x16x1xf32>
    %cst_14 = arith.constant 0.000000e+00 : f32
    %36 = vector.broadcast %cst_14 : f32 to vector<1x16x16xf32>
    %37 = arith.select %7, %36, %31 : vector<1x16x16xi1>, vector<1x16x16xf32>
    %cst_15 = arith.constant dense<0.000000e+00> : vector<1x16xf32>
    %38 = vector.multi_reduction <add>, %37, %cst_15 [2] : vector<1x16x16xf32> to vector<1x16xf32>
    %39 = vector.shape_cast %38 : vector<1x16xf32> to vector<1x16x1xf32>
    %40 = vector.shape_cast %35 : vector<1x16x1xf32> to vector<1x16x1xf32>
    %41 = vector.broadcast %40 : vector<1x16x1xf32> to vector<1x16x16xf32>
    %42 = vector.shape_cast %39 : vector<1x16x1xf32> to vector<1x16x1xf32>
    %43 = vector.broadcast %42 : vector<1x16x1xf32> to vector<1x16x16xf32>
    %44 = arith.select %7, %41, %43 : vector<1x16x16xi1>, vector<1x16x16xf32>
    %45 = arith.divf %31, %44 : vector<1x16x16xf32>
    %46 = vector.extract_strided_slice %45 {offsets = [0, 0, 0], sizes = [1, 8, 16], strides = [1, 1, 1]} : vector<1x16x16xf32> to vector<1x8x16xf32>
    "tpu.trace_start"() <{level = 10 : i32, message = "bji,bjd->bid"}> : () -> ()
    %cst_16 = arith.constant dense<0.000000e+00> : vector<1x16x32xf32>
    %47 = tpu.matmul %46, %0, %cst_16 {dimension_numbers = #tpu.dot_dimension_numbers<[1], [1], [2], [2], [0, 0, 0, 2, 1, 2], [0], [0]>} : vector<1x8x16xf32>, vector<1x8x32xf32>, vector<1x16x32xf32> -> vector<1x16x32xf32>
    "tpu.trace_stop"() : () -> ()
    %48 = vector.extract_strided_slice %45 {offsets = [0, 8, 0], sizes = [1, 8, 16], strides = [1, 1, 1]} : vector<1x16x16xf32> to vector<1x8x16xf32>
    "tpu.trace_start"() <{level = 10 : i32, message = "bji,bjd->bid"}> : () -> ()
    %cst_17 = arith.constant dense<0.000000e+00> : vector<1x16x32xf32>
    %49 = tpu.matmul %48, %1, %cst_17 {dimension_numbers = #tpu.dot_dimension_numbers<[1], [1], [2], [2], [0, 0, 0, 2, 1, 2], [0], [0]>} : vector<1x8x16xf32>, vector<1x8x32xf32>, vector<1x16x32xf32> -> vector<1x16x32xf32>
    "tpu.trace_stop"() : () -> ()
    %50 = arith.mulf %47, %47 : vector<1x16x32xf32>
    %cst_18 = arith.constant dense<0.000000e+00> : vector<1x16xf32>
    %51 = vector.multi_reduction <add>, %50, %cst_18 [2] : vector<1x16x32xf32> to vector<1x16xf32>
    %52 = vector.shape_cast %51 : vector<1x16xf32> to vector<1x16x1xf32>
    %cst_19 = arith.constant 1.000000e-24 : f32
    %53 = vector.broadcast %cst_19 : f32 to vector<1x16x1xf32>
    %54 = arith.maximumf %52, %53 : vector<1x16x1xf32>
    %55 = math.rsqrt %54 : vector<1x16x1xf32>
    %56 = vector.broadcast %55 : vector<1x16x1xf32> to vector<1x16x32xf32>
    %57 = arith.mulf %47, %56 : vector<1x16x32xf32>
    %58 = arith.mulf %49, %49 : vector<1x16x32xf32>
    %cst_20 = arith.constant dense<0.000000e+00> : vector<1x16xf32>
    %59 = vector.multi_reduction <add>, %58, %cst_20 [2] : vector<1x16x32xf32> to vector<1x16xf32>
    %60 = vector.shape_cast %59 : vector<1x16xf32> to vector<1x16x1xf32>
    %cst_21 = arith.constant 1.000000e-24 : f32
    %61 = vector.broadcast %cst_21 : f32 to vector<1x16x1xf32>
    %62 = arith.maximumf %60, %61 : vector<1x16x1xf32>
    %63 = math.rsqrt %62 : vector<1x16x1xf32>
    %64 = vector.broadcast %63 : vector<1x16x1xf32> to vector<1x16x32xf32>
    %65 = arith.mulf %49, %64 : vector<1x16x32xf32>
    %66 = vector.extract_strided_slice %57 {offsets = [0, 0, 0], sizes = [1, 8, 32], strides = [1, 1, 1]} : vector<1x16x32xf32> to vector<1x8x32xf32>
    %67 = vector.extract_strided_slice %65 {offsets = [0, 0, 0], sizes = [1, 8, 32], strides = [1, 1, 1]} : vector<1x16x32xf32> to vector<1x8x32xf32>
    %68 = tpu.concatenate %66, %67 in 1 : vector<1x8x32xf32>, vector<1x8x32xf32> -> vector<1x16x32xf32>
    %69 = vector.extract_strided_slice %57 {offsets = [0, 8, 0], sizes = [1, 8, 32], strides = [1, 1, 1]} : vector<1x16x32xf32> to vector<1x8x32xf32>
    %70 = vector.extract_strided_slice %65 {offsets = [0, 8, 0], sizes = [1, 8, 32], strides = [1, 1, 1]} : vector<1x16x32xf32> to vector<1x8x32xf32>
    %71 = tpu.concatenate %69, %70 in 1 : vector<1x8x32xf32>, vector<1x8x32xf32> -> vector<1x16x32xf32>
    "tpu.trace_start"() <{level = 10 : i32, message = "bnd,bmd->bnm"}> : () -> ()
    %cst_22 = arith.constant dense<0.000000e+00> : vector<1x16x16xf32>
    %72 = tpu.matmul %68, %71, %cst_22 {dimension_numbers = #tpu.dot_dimension_numbers<[2], [2], [1], [1], [0, 0, 0, 1, 1, 1], [0], [0]>} : vector<1x16x32xf32>, vector<1x16x32xf32>, vector<1x16x16xf32> -> vector<1x16x16xf32>
    "tpu.trace_stop"() : () -> ()
    %cst_23 = arith.constant 3.000000e+01 : f32
    %73 = vector.broadcast %cst_23 : f32 to vector<1x16x16xf32>
    %74 = arith.mulf %72, %73 : vector<1x16x16xf32>
    %cst_24 = arith.constant 0.000000e+00 : f32
    %75 = vector.broadcast %cst_24 : f32 to vector<1x16x16xf32>
    %76 = arith.select %12, %74, %75 : vector<1x16x16xi1>, vector<1x16x16xf32>
    %cst_25 = arith.constant dense<0.000000e+00> : vector<1x16xf32>
    %77 = vector.multi_reduction <add>, %76, %cst_25 [1] : vector<1x16x16xf32> to vector<1x16xf32>
    %78 = vector.shape_cast %77 : vector<1x16xf32> to vector<1x1x16xf32>
    %cst_26 = arith.constant -1.000000e+30 : f32
    %79 = vector.broadcast %cst_26 : f32 to vector<1x16x16xf32>
    %80 = arith.select %14, %74, %79 : vector<1x16x16xi1>, vector<1x16x16xf32>
    %cst_27 = arith.constant dense<0xFF800000> : vector<1x16xf32>
    %81 = vector.multi_reduction <maximumf>, %80, %cst_27 [1] : vector<1x16x16xf32> to vector<1x16xf32>
    %82 = vector.shape_cast %81 : vector<1x16xf32> to vector<1x1x16xf32>
    %83 = vector.broadcast %82 : vector<1x1x16xf32> to vector<1x16x16xf32>
    %84 = arith.subf %80, %83 : vector<1x16x16xf32>
    %85 = math.exp %84 : vector<1x16x16xf32>
    %cst_28 = arith.constant dense<0.000000e+00> : vector<1x16xf32>
    %86 = vector.multi_reduction <add>, %85, %cst_28 [1] : vector<1x16x16xf32> to vector<1x16xf32>
    %87 = vector.shape_cast %86 : vector<1x16xf32> to vector<1x1x16xf32>
    %88 = arith.subf %78, %82 : vector<1x1x16xf32>
    %89 = math.log %87 : vector<1x1x16xf32>
    %90 = arith.subf %88, %89 : vector<1x1x16xf32>
    %cst_29 = arith.constant dense<0.000000e+00> : vector<1x1xf32>
    %91 = vector.multi_reduction <add>, %90, %cst_29 [2] : vector<1x1x16xf32> to vector<1x1xf32>
    %cst_30 = arith.constant -1.250000e-01 : f32
    %92 = vector.broadcast %cst_30 : f32 to vector<1x1xf32>
    %93 = arith.mulf %91, %92 : vector<1x1xf32>
    %94 = vector.shape_cast %93 : vector<1x1xf32> to vector<1x1x1xf32>
    %c0_31 = arith.constant 0 : index
    %c0_32 = arith.constant 0 : index
    %c0_33 = arith.constant 0 : index
    %95 = vector.load %arg3[%c0_31, %c0_32, %c0_33] : memref<1x1x1xf32, #tpu.memory_space<vmem>>, vector<1x1x1xf32>
    tpu.vector_store %arg3[%c0_31, %c0_32, %c0_33], %94 {strides = array<i32>} : memref<1x1x1xf32, #tpu.memory_space<vmem>>, vector<1x1x1xf32>,
    return
  }
  func.func @transform_0(%arg0: i32) -> (i32, i32, i32) {
    %c0_i32 = arith.constant 0 : i32
    %c0_i32_0 = arith.constant 0 : i32
    %c0_i32_1 = arith.constant 0 : i32
    return %arg0, %c0_i32, %c0_i32_0 : i32, i32, i32
  }
  func.func @transform_1(%arg0: i32) -> (i32, i32, i32) {
    %c0_i32 = arith.constant 0 : i32
    %c0_i32_0 = arith.constant 0 : i32
    %c0_i32_1 = arith.constant 0 : i32
    return %arg0, %c0_i32, %c0_i32_0 : i32, i32, i32
  }
  func.func @transform_2(%arg0: i32) -> (i32, i32, i32) {
    %c0_i32 = arith.constant 0 : i32
    %c0_i32_0 = arith.constant 0 : i32
    %c0_i32_1 = arith.constant 0 : i32
    return %arg0, %c0_i32, %c0_i32_0 : i32, i32, i32
  }
}

</mosaic_0001>

<bundles_post_ra>
// kernel: cloob_loss.1
= control target key start
LH: loop header
LB: loop body
LE: loop exit
PB: predicated region body
PF: predicated region fallthrough
CT: control target
= control target key end

     0   :  { %7 = vsyncpa [#allocation3], 0  ;;  %s833_s0 = inlined_call_operand.hbm [shape: f32[1,8,32], index: 0, kind: input, shape index: {}]   ;;  %s834_s1 = inlined_call_operand.hbm [shape: f32[1,8,32], index: 1, kind: input, shape index: {}]   ;;  %s835_s2 = inlined_call_operand.hbm [shape: f32[1,1,1], index: 2, kind: output, shape index: {}]  }
   0x1   :  { %8 = vsyncpa [#allocation6], 0 }
   0x2   :  { %9 = vsyncpa [#allocation4], 0  ;;  %s737_s9 = smov [#allocation2]   ;;  %s738_s11 = smov [#allocation5]  }
   0x3   :  { %s16_s10 = sshll.u32 %s737_s9, 4  ;;  %s26_s12 = sshll.u32 %s738_s11, 4  ;;  %s17_s10 = int_to_ptr.vmem [resolvable:$true] %s16_s10  ;;  %s27_s12 = int_to_ptr.vmem [resolvable:$true] %s26_s12 }
   0x4   :  { %s679_s13 = scalar_lea.vmem %s17_s10, 128  ;;  %p684_p1 = scmp.lt.s32.totalorder %s17_s10, %s17_s10 }
   0x5   :  { %p680_p0 = scmp.ne.s32.totalorder %s17_s10, %s679_s13  ;;  %p685_p2 = scmp.lt.s32.totalorder %s679_s13, %s679_s13 }
   0x7   :  { %p686_p3 = por %p685_p2, %p684_p1 }
   0x9   :  { %p687_p4 = pnand %p686_p3, %p680_p0 }
   0xb   :  { %690 = shalt.err (!%p687_p4)
}
   0xc   :  { %19 = dma.hbm_to_vmem [thread:$0]  %s833_s0, 128, %s17_s10, [#allocation3]  }
   0xd   :  { %s699_s16 = scalar_lea.vmem %s27_s12, 128  ;;  %p704_p6 = scmp.lt.s32.totalorder %s27_s12, %s27_s12 }
   0xe   :  { %p700_p5 = scmp.ne.s32.totalorder %s27_s12, %s699_s16  ;;  %p705_p7 = scmp.lt.s32.totalorder %s699_s16, %s699_s16 }
  0x10   :  { %p706_p8 = por %p705_p7, %p704_p6 }
  0x12   :  { %p707_p9 = pnand %p706_p8, %p700_p5 }
  0x14   :  { %710 = shalt.err (!%p707_p9)
}
  0x15   :  { %29 = dma.hbm_to_vmem [thread:$0]  %s834_s1, 128, %s27_s12, [#allocation6]  }
  0x16   :  { %731 = dma.done.wait [#allocation3], 128  }
  0x17   :  { %732 = vsyncadd [#allocation3], 4294967168 }
  0x18   :  { %733 = dma.done.wait [#allocation6], 128  }
  0x19   :  { %734 = vsyncadd [#allocation6], 4294967168  ;;  %vm38_vm0 = vcmask 261120   ;;  %v37_v0 = vld [vmem:[#allocation5] sm:$0xff]  ;;  %v36_v1 = vld [vmem:[#allocation2] sm:$0xff]  ;;  %v120_v2 = vlaneseq  ;;  %vm142_vm2 = vcmask 130048  }
  0x1a   :  { %620 = vmatprep.subr.msk.mxu0 %vm38_vm0, %v37_v0  ;;  %624 = vmatprep.mubr.msk.f32.mxu0 %vm38_vm0, %v36_v1  ;;  %vm219_vm3 = vcmask 64512   ;;  %vm739_vm4 = vmmov 1   ;;  %s740_s0 = smov [#allocation7]   ;;  %vm576_vm14 = vcmask 0  }
  0x1b   :  { %621 = vmatpush3.xpose.msk.msra.mxu0 %vm38_vm0, %v37_v0  ;;  %632 = vmatprep.subr.mxu1 %v37_v0  ;;  %v769_v3 = vand.u32 127, %v120_v2  ;;  %s584_s1 = sshll.u32 %s740_s0, 4  ;;  %s585_s1 = int_to_ptr.vmem [resolvable:$true] %s584_s1 }
  0x1c   :  { %622 = vmatprep.subr.msk.mxu0 %vm38_vm0, %v36_v1  ;;  %633 = vmatpush3.msra.mxu1 %v37_v0  ;;  %s711_s19 = scalar_lea.vmem %s585_s1, 16  ;;  %s715_s20 = scalar_lea.vmem %s585_s1, 32 }
  0x1d   :  { %vm125_vm1 = vcmp.lt.s32.totalorder %v769_v3, 8  ;;  %p712_p10 = scmp.ne.s32.totalorder %s585_s1, %s711_s19  ;;  %p716_p11 = scmp.lt.s32.totalorder %s585_s1, %s585_s1 }
  0x1e   :  { %vm128_vm5 = vmxor %vm739_vm4, %vm125_vm1  ;;  %p717_p12 = scmp.lt.s32.totalorder %s715_s20, %s711_s19 }
  0x1f   :  { %623 = vmatpush3.xpose.msk.msra.mxu0 %vm38_vm0, %v36_v1  ;;  %vm131_vm6 = vmxor %vm125_vm1, %vm739_vm4 }
  0x20   :  { %627 = vmatprep.subr.mxu0 %v36_v1  ;;  %vm130_vm8 = vmxor %vm128_vm5, %vm739_vm4  ;;  %p718_p13 = por %p717_p12, %p716_p11 }
  0x22   :  { %625 = vmatmul.mubr.msk.f32.vlgmr.msra.gmra.mxu0 %vm38_vm0, %v37_v0  ;;  %p719_p0 = pnand %p718_p13, %p712_p10 }
  0x23   :  { %628 = vmatpush3.msra.mxu0 %v36_v1 }
  0xe2   :  { %v626_v4 = vpop.f32.mrf.mxu0 }
  0xe3   :  { %v139_v5 = vmul.f32 8.0, %v626_v4 }
  0xe4   :  { %v111_v6 = vpop.f32.mrf.mxu0 }
  0xe5   :  { %v138_v7 = vmul.f32 8.0, %v111_v6  ;;  %v141_v8 = vsel %vm125_vm1, %v139_v5, -1e+30  ;;  %v150_v11 = vsel %vm125_vm1, -1e+30, %v139_v5 }
  0xe6   :  { %v146_v9 = vsel %vm142_vm2, %v141_v8, -inf  ;;  %v154_v14 = vsel %vm142_vm2, %v150_v11, -inf }
  0xe7   :  { %147 = vmax.xlane.f32.xlu0 %v146_v9  ;;  %v140_v10 = vsel %vm125_vm1, %v138_v7, -1e+30  ;;  %v149_v13 = vsel %vm125_vm1, -1e+30, %v138_v7 }
  0xe8   :  { %v143_v12 = vsel %vm142_vm2, %v140_v10, -inf  ;;  %v151_v15 = vsel %vm142_vm2, %v149_v13, -inf }
  0xe9   :  { %144 = vmax.xlane.f32.xlu1 %v143_v12 }
  0xeb   :  { %155 = vmax.xlane.f32.xlu0 %v154_v14 }
  0xed   :  { %152 = vmax.xlane.f32.xlu1 %v151_v15 }
 0x170   :  { %v148_v16 = vpop.xlane.xlu0 %147 }
 0x172   :  { %v145_v17 = vpop.xlane.xlu1 %144 }
 0x174   :  { %v156_v18 = vpop.xlane.xlu0 %155 }
 0x175   :  { %v158_v19 = vsel %vm125_vm1, %v148_v16, %v156_v18  ;;  %v121_v16 = vshrl.u32 %v120_v2, 7 }
 0x176   :  { %v160_v20 = vsub.f32 %v139_v5, %v158_v19  ;;  %v153_v21 = vpop.xlane.xlu1 %152 }
 0x177   :  { %v157_v22 = vsel %vm125_vm1, %v145_v17, %v153_v21  ;;  %v122_v17 = vadd.s32 8, %v121_v16  ;;  %vm134_vm9 = vcmp.ne.s32.totalorder %v121_v16, %v769_v3  ;;  %vm132_vm12 = vcmp.eq.s32.totalorder %v121_v16, %v769_v3 }
 0x178   :  { %v163_v23 = vmul.f32 1.442695, %v160_v20  ;;  %v159_v24 = vsub.f32 %v138_v7, %v157_v22  ;;  %vm136_vm11 = vmand %vm130_vm8, %vm134_vm9 }
 0x179   :  { %vm135_vm7 = vcmp.ne.s32.totalorder %v122_v17, %v769_v3  ;;  %vm133_vm13 = vcmp.eq.s32.totalorder %v122_v17, %v769_v3 }
 0x17a   :  { %649 = vpow2.f32 %v163_v23  ;;  %v161_v25 = vmul.f32 1.442695, %v159_v24  ;;  %vm137_vm10 = vmand %vm131_vm6, %vm135_vm7 }
 0x17c   :  { %651 = vpow2.f32 %v161_v25 }
 0x187   :  { %v650_v26 = vpop.eup %649 }
 0x188   :  { %v166_v27 = vsel %vm125_vm1, %v650_v26, 0.0  ;;  %v174_v28 = vsel %vm125_vm1, 0.0, %v650_v26 }
 0x189   :  { %v652_v29 = vpop.eup %651  ;;  %v170_v30 = vsel %vm142_vm2, %v166_v27, 0.0  ;;  %v178_v31 = vsel %vm142_vm2, %v174_v28, 0.0 }
 0x18a   :  { %171 = vadd.xlane.f32.xlu0 %v170_v30  ;;  %179 = vadd.xlane.f32.xlu1 %v178_v31  ;;  %v173_v32 = vsel %vm125_vm1, 0.0, %v652_v29  ;;  %v165_v33 = vsel %vm125_vm1, %v652_v29, 0.0 }
 0x18b   :  { %v175_v34 = vsel %vm142_vm2, %v173_v32, 0.0  ;;  %v167_v35 = vsel %vm142_vm2, %v165_v33, 0.0 }
 0x18e   :  { %176 = vadd.xlane.f32.xlu1 %v175_v34  ;;  %168 = vadd.xlane.f32.xlu0 %v167_v35 }
 0x213   :  { %v172_v36 = vpop.xlane.xlu0 %171  ;;  %v180_v37 = vpop.xlane.xlu1 %179 }
 0x214   :  { %v182_v38 = vsel %vm125_vm1, %v172_v36, %v180_v37 }
 0x215   :  { %653 = vrcp.f32 %v182_v38 }
 0x217   :  { %v169_v39 = vpop.xlane.xlu0 %168  ;;  %v177_v40 = vpop.xlane.xlu1 %176 }
 0x218   :  { %v181_v41 = vsel %vm125_vm1, %v169_v39, %v177_v40 }
 0x219   :  { %655 = vrcp.f32 %v181_v41 }
 0x222   :  { %v654_v42 = vpop.eup %653 }
 0x223   :  { %v186_v43 = vmul.f32 %v654_v42, %v650_v26 }
 0x225   :  { %301 = vxpose.xlu0.b32.start.end [1/1] (short) (narrow) %v186_v43, 16 }
 0x226   :  { %v656_v44 = vpop.eup %655 }
 0x227   :  { %v184_v45 = vmul.f32 %v656_v44, %v652_v29 }
 0x229   :  { %187 = vxpose.xlu1.b32.start.end [1/1] (short) (narrow) %v184_v45, 16 }
 0x2a1   :  { %v317_v46 = vpop.trf.xlu0 }
 0x2a2   :  { %634 = vmatprep.mubr.msk.f32.mxu1 %vm219_vm3, %v317_v46 }
 0x2a5   :  { %v318_v47 = vpop.trf.xlu0  ;;  %v203_v48 = vpop.trf.xlu1 }
 0x2a6   :  { %629 = vmatprep.mubr.msk.f32.mxu0 %vm219_vm3, %v203_v48  ;;  %635 = vmatmul.mubr.msk.f32.vlgmr.msra.gmra.mxu1 %vm219_vm3, %v318_v47 }
 0x2a9   :  { %v204_v49 = vpop.trf.xlu1 }
 0x2aa   :  { %630 = vmatmul.mubr.msk.f32.vlgmr.msra.gmra.mxu0 %vm219_vm3, %v204_v49 }
 0x366   :  { %v636_v50 = vpop.f32.mrf.mxu1 }
 0x367   :  { %v429_v51 = vmul.f32 %v636_v50, %v636_v50 }
 0x368   :  { %v405_v53 = vpop.f32.mrf.mxu1 }
 0x369   :  { %v433_v52 = vsel %vm38_vm0, %v429_v51, 0.0  ;;  %v428_v57 = vmul.f32 %v405_v53, %v405_v53 }
 0x36a   :  { %434 = vadd.xlane.f32.xlu0 %v433_v52  ;;  %v631_v54 = vpop.f32.mrf.mxu0 }
 0x36b   :  { %v415_v55 = vmul.f32 %v631_v54, %v631_v54  ;;  %v430_v61 = vsel %vm38_vm0, %v428_v57, 0.0 }
 0x36c   :  { %v292_v56 = vpop.f32.mrf.mxu0 }
 0x36d   :  { %v414_v58 = vmul.f32 %v292_v56, %v292_v56  ;;  %v419_v59 = vsel %vm38_vm0, %v415_v55, 0.0 }
 0x36e   :  { %420 = vadd.xlane.f32.xlu1 %v419_v59 }
 0x36f   :  { %v416_v60 = vsel %vm38_vm0, %v414_v58, 0.0 }
 0x370   :  { %417 = vadd.xlane.f32.xlu0 %v416_v60 }
 0x372   :  { %431 = vadd.xlane.f32.xlu1 %v430_v61 }
 0x3f3   :  { %v435_v62 = vpop.xlane.xlu0 %434 }
 0x3f4   :  { %v437_v63 = vmax.f32 %v435_v62, 1e-24 }
 0x3f6   :  { %657 = vrsqrt.f32 %v437_v63 }
 0x3f7   :  { %v421_v0 = vpop.xlane.xlu1 %420 }
 0x3f8   :  { %v423_v1 = vmax.f32 %v421_v0, 1e-24 }
 0x3f9   :  { %v418_v4 = vpop.xlane.xlu0 %417 }
 0x3fa   :  { %659 = vrsqrt.f32 %v423_v1  ;;  %v422_v5 = vmax.f32 %v418_v4, 1e-24 }
 0x3fb   :  { %v432_v6 = vpop.xlane.xlu1 %431 }
 0x3fc   :  { %661 = vrsqrt.f32 %v422_v5  ;;  %v436_v7 = vmax.f32 %v432_v6, 1e-24 }
 0x3fe   :  { %663 = vrsqrt.f32 %v436_v7 }
 0x403   :  { %v658_v8 = vpop.eup %657 }
 0x404   :  { %v441_v9 = vmul.f32 %v658_v8, %v636_v50 }
 0x406   :  { %637 = vmatprep.subr.msk.mxu1 %vm38_vm0, %v441_v9 }
 0x407   :  { %v660_v10 = vpop.eup %659  ;;  %638 = vmatpush3.xpose.msk.msra.mxu1 %vm38_vm0, %v441_v9 }
 0x408   :  { %v427_v11 = vmul.f32 %v660_v10, %v631_v54 }
 0x409   :  { %v662_v12 = vpop.eup %661 }
 0x40a   :  { %639 = vmatprep.subr.msk.mxu1 %vm38_vm0, %v427_v11  ;;  %v426_v13 = vmul.f32 %v662_v12, %v292_v56 }
 0x40b   :  { %v664_v14 = vpop.eup %663  ;;  %640 = vmatpush3.xpose.msk.msra.mxu1 %vm38_vm0, %v427_v11 }
 0x40c   :  { %641 = vmatprep.mubr.msk.f32.mxu1 %vm38_vm0, %v426_v13  ;;  %v440_v15 = vmul.f32 %v664_v14, %v405_v53 }
 0x40e   :  { %642 = vmatmul.mubr.msk.f32.vlgmr.msra.gmra.mxu1 %vm38_vm0, %v440_v15 }
 0x4ce   :  { %v643_v18 = vpop.f32.mrf.mxu1 }
 0x4cf   :  { %v530_v19 = vmul.f32 30.0, %v643_v18 }
 0x4d0   :  { %v520_v20 = vpop.f32.mrf.mxu1 }
 0x4d1   :  { %v543_v21 = vsel %vm137_vm10, %v530_v19, -1e+30  ;;  %v529_v2 = vmul.f32 30.0, %v520_v20  ;;  %v532_v37 = vsel %vm133_vm13, %v530_v19, 0.0 }
 0x4d2   :  { %v545_v23 = vsel %vm142_vm2, %v543_v21, -inf  ;;  %v534_v42 = vsel %vm142_vm2, %v532_v37, 0.0 }
 0x4d3   :  { %v542_v22 = vsel %vm136_vm11, %v529_v2, -1e+30  ;;  %v531_v36 = vsel %vm132_vm12, %v529_v2, 0.0 }
 0x4d4   :  { %v544_v24 = vsel %vm142_vm2, %v542_v22, -inf  ;;  %v533_v39 = vsel %vm142_vm2, %v531_v36, 0.0 }
 0x4d5   :  { %v546_v25 = vmax.f32 %v544_v24, %v545_v23  ;;  %v535_v44 = vadd.f32 %v534_v42, %v533_v39 }
 0x4d7   :  { %v547_v26 = vrot.slane %v546_v25, 4  ;;  %v536_v47 = vrot.slane %v535_v44, 4 }
 0x4d9   :  { %v548_v27 = vmax.f32 %v546_v25, %v547_v26  ;;  %v537_v50 = vadd.f32 %v536_v47, %v535_v44 }
 0x4db   :  { %v549_v28 = vrot.slane %v548_v27, 2  ;;  %v538_v52 = vrot.slane %v537_v50, 2 }
 0x4dd   :  { %v550_v29 = vmax.f32 %v548_v27, %v549_v28  ;;  %v539_v54 = vadd.f32 %v538_v52, %v537_v50 }
 0x4df   :  { %v551_v30 = vrot.slane %v550_v29, 1  ;;  %v540_v55 = vrot.slane %v539_v54, 1 }
 0x4e1   :  { %v552_v31 = vmax.f32 %v550_v29, %v551_v30  ;;  %v541_v56 = vadd.f32 %v540_v55, %v539_v54 }
 0x4e3   :  { %v553_v32 = vsub.f32 %v542_v22, %v552_v31  ;;  %v554_v33 = vsub.f32 %v543_v21, %v552_v31  ;;  %v568_v58 = vsub.f32 %v541_v56, %v552_v31 }
 0x4e5   :  { %v555_v34 = vmul.f32 1.442695, %v553_v32  ;;  %v557_v35 = vmul.f32 1.442695, %v554_v33 }
 0x4e7   :  { %665 = vpow2.f32 %v555_v34 }
 0x4e8   :  { %667 = vpow2.f32 %v557_v35 }
 0x4f4   :  { %v666_v38 = vpop.eup %665 }
 0x4f5   :  { %v668_v40 = vpop.eup %667  ;;  %v559_v41 = vsel %vm142_vm2, %v666_v38, 0.0 }
 0x4f6   :  { %v560_v43 = vsel %vm142_vm2, %v668_v40, 0.0 }
 0x4f7   :  { %v561_v45 = vadd.f32 %v560_v43, %v559_v41 }
 0x4f9   :  { %v562_v46 = vrot.slane %v561_v45, 4 }
 0x4fb   :  { %v563_v48 = vadd.f32 %v562_v46, %v561_v45 }
 0x4fd   :  { %v564_v49 = vrot.slane %v563_v48, 2 }
 0x4ff   :  { %v565_v3 = vadd.f32 %v564_v49, %v563_v48 }
 0x501   :  { %v566_v51 = vrot.slane %v565_v3, 1 }
 0x503   :  { %v567_v53 = vadd.f32 %v566_v51, %v565_v3 }
 0x505   :  { %669 = vlog2.f32 %v567_v53 }
 0x512   :  { %v670_v57 = vpop.eup %669 }
 0x513   :  { %v570_v59 = vmul.f32 0.6931472, %v670_v57 }
 0x515   :  { %v571_v60 = vsub.f32 %v568_v58, %v570_v59 }
 0x517   :  { %v572_v61 = vsel %vm142_vm2, %v571_v60, 0.0 }
 0x518   :  { %573 = vadd.xlane.f32.xlu0 %v572_v61 }
 0x5a1   :  { %v574_v62 = vpop.xlane.xlu0 %573 }
 0x5a2   :  { %v575_v63 = vmul.f32 -0.125, %v574_v62 }
 0x5a4   :  { %577 = vst.msk [vmem:[#allocation7] sm:$0x1] %vm576_vm14, %v575_v63 }
 0x5a5   :  { %722 = shalt.err (!%p719_p0)
}
 0x5a6   :  { %587 = dma.vmem_to_hbm [thread:$0]  %s585_s1, 16, %s835_s2, [#allocation4]  }
 0x5a7   :  { %735 = dma.done.wait [#allocation4], 16  }
 0x5a8   :  { %736 = vsyncadd [#allocation4], 4294967280 }
 0x5a9   :  { %591 = vsyncpa [#allocation3], 1 }
 0x5aa   :  { %592 = vsyncpa [#allocation6], 1 }
 0x5ab   :  { %593 = vsyncpa [#allocation4], 1 }

</bundles_post_ra>
